<compile_context>
chip_gen: v5e
topology: v5e:2x2
jax: 0.10.0
libtpu: 0.0.40
codegen_flags: <defaults>
</compile_context>

<pallas_src>
import math
import functools

import jax
import jax.numpy as jnp
from jax.experimental import pallas as pl
from jax.experimental.pallas import tpu as pltpu


def _cdiv(a, b):
    return -(-a // b)


def _round_up(a, b):
    return _cdiv(a, b) * b


# ---------------------------------------------------------------------------
# Pass 1: per-channel sum / sum-of-squares of the (pre-BN) conv output,
# emitted as per-block partial sums (grid axis fully parallel).
# ---------------------------------------------------------------------------
def _stats_kernel(x_ref, w_ref, sum_ref, sq_ref):
    # (tm//G, 128) @ (128, G*Cout) on the MXU; packed-lane layout.
    y = jnp.dot(x_ref[...], w_ref[...], preferred_element_type=jnp.float32)
    s = jnp.sum(y, axis=0, keepdims=True)        # (1, G*Cout)
    q = jnp.sum(y * y, axis=0, keepdims=True)    # (1, G*Cout)
    sum_ref[...] = s[None]                       # (1, 1, G*Cout) block
    sq_ref[...] = q[None]


# ---------------------------------------------------------------------------
# Pass 2: recompute the matmul and fuse BN affine + optional ReLU into the
# final lane-dense store (no (M, Cout) intermediate ever touches HBM).
# ---------------------------------------------------------------------------
def _fused_matmul_bn_kernel(x_ref, w_ref, scale_ref, shift_ref, o_ref, *,
                            apply_relu):
    y = jnp.dot(x_ref[...], w_ref[...], preferred_element_type=jnp.float32)
    y = y * scale_ref[...] + shift_ref[...]
    if apply_relu:
        y = jnp.maximum(y, 0.0)
    o_ref[...] = y.astype(o_ref.dtype)


# ---------------------------------------------------------------------------
# Single conv2d_ layer: 1x1 conv -> train-mode BatchNorm2d -> optional ReLU.
# ---------------------------------------------------------------------------
@functools.partial(jax.jit,
                   static_argnames=("eps", "apply_relu", "tm_target"))
def conv2d_forward(x, weight, bias, gamma, beta, *, eps=1e-5, apply_relu=True,
                   tm_target=8192):
    """x: (B, T, N, Cin) -> (B, T, N, Cout), float32, train-mode BN stats."""
    del bias  # Per-channel constant; cancelled exactly by BN mean subtraction.

    B, T, N, Cin = x.shape
    Cout = weight.shape[0]
    M = B * T * N

    # TODO(synk): lane-packed layout requires Cin | 128 (true for FC usage).
    assert 128 % Cin == 0, "packed layout needs Cin to divide 128"
    G = 128 // Cin          # original rows packed per 128-lane row
    GC = G * Cout           # packed output lane width (multiple of 128 when Cin|Cout)

    # ---- choose the row tile (in original rows), sized against scoped VMEM.
    align = 8 * G                                  # keeps block sublane dims % 8 == 0
    budget = 12 * 1024 * 1024                      # stay under v5e's 16 MiB default
    fixed = 2 * 128 * GC * 4                       # w_big (conservatively x2)
    per_row = 2 * (Cin + Cout) * 4                 # double-buffered in + out per row
    tm_cap = max(align, ((max(budget - fixed, 0)) // per_row) // align * align)
    tgt = max(align, min(tm_target, tm_cap))
    nblk = _cdiv(M, tgt)
    tm = _round_up(_cdiv(M, nblk), align)
    Mp = nblk * tm

    # ---- lane-dense packing (pure row-major reshapes; pad tail with zero rows,
    #      which contribute nothing to the sums since bias is dropped).
    xf = x.reshape(M, Cin).astype(jnp.float32)
    if Mp != M:
        xf = jnp.pad(xf, ((0, Mp - M), (0, 0)))
    xp = xf.reshape(Mp // G, 128)

    wt = weight.reshape(Cout, Cin).T.astype(jnp.float32)        # (Cin, Cout)
    eye = jnp.eye(G, dtype=jnp.float32)
    # Block-diagonal replication: w_big[q*Cin+ci, q*Cout+co] = wt[ci, co]
    w_big = (eye[:, None, :, None] * wt[None, :, None, :]).reshape(128, GC)

    grid = (nblk,)
    x_spec = pl.BlockSpec((tm // G, 128), lambda i: (i, 0))
    w_spec = pl.BlockSpec((128, GC), lambda i: (0, 0))

    # ---- pass 1: batch statistics as parallel per-block partial sums.
    part_sum, part_sq = pl.pallas_call(
        _stats_kernel,
        out_shape=(jax.ShapeDtypeStruct((nblk, 1, GC), jnp.float32),
                   jax.ShapeDtypeStruct((nblk, 1, GC), jnp.float32)),
        grid_spec=pltpu.PrefetchScalarGridSpec(
            num_scalar_prefetch=0,
            grid=grid,
            in_specs=[x_spec, w_spec],
            out_specs=[pl.BlockSpec((1, 1, GC), lambda i: (i, 0, 0)),
                       pl.BlockSpec((1, 1, GC), lambda i: (i, 0, 0))],
        ),
        compiler_params=pltpu.CompilerParams(
            dimension_semantics=("parallel",)),
        cost_estimate=pl.CostEstimate(
            flops=2 * Mp * Cin * Cout,
            transcendentals=0,
            bytes_accessed=(Mp * Cin + 128 * GC + 2 * nblk * GC) * 4),
    )(xp, w_big)

    # ---- tiny per-channel glue (train-mode BatchNorm2d, biased variance).
    ch_sum = part_sum.sum(axis=(0, 1)).reshape(G, Cout).sum(axis=0)   # (Cout,)
    ch_sq = part_sq.sum(axis=(0, 1)).reshape(G, Cout).sum(axis=0)     # (Cout,)
    mean = ch_sum / M
    var = jnp.maximum(ch_sq / M - mean * mean, 0.0)   # clamp E[y^2]-E[y]^2 >= 0
    inv_std = jax.lax.rsqrt(var + eps)
    scale = gamma.astype(jnp.float32) * inv_std                       # (Cout,)
    shift = beta.astype(jnp.float32) - mean * scale                   # (Cout,)
    scale_p = jnp.tile(scale, G).reshape(1, GC)    # lane p -> channel p % Cout
    shift_p = jnp.tile(shift, G).reshape(1, GC)

    # ---- pass 2: recompute matmul, fuse BN + ReLU, lane-dense store.
    out_p = pl.pallas_call(
        functools.partial(_fused_matmul_bn_kernel, apply_relu=apply_relu),
        out_shape=jax.ShapeDtypeStruct((Mp // G, GC), jnp.float32),
        grid_spec=pltpu.PrefetchScalarGridSpec(
            num_scalar_prefetch=0,
            grid=grid,
            in_specs=[x_spec, w_spec,
                      pl.BlockSpec((1, GC), lambda i: (0, 0)),
                      pl.BlockSpec((1, GC), lambda i: (0, 0))],
            out_specs=pl.BlockSpec((tm // G, GC), lambda i: (i, 0)),
        ),
        compiler_params=pltpu.CompilerParams(
            dimension_semantics=("parallel",)),
        cost_estimate=pl.CostEstimate(
            flops=2 * Mp * Cin * Cout,
            transcendentals=0,
            bytes_accessed=(Mp * Cin + Mp * Cout + 128 * GC + 2 * GC) * 4),
    )(xp, w_big, scale_p, shift_p)

    return out_p.reshape(Mp, Cout)[:M].reshape(B, T, N, Cout)


# ---------------------------------------------------------------------------
# FC forward: chain of conv2d_ layers.
#   layers: sequence of (weight, bias, gamma, beta, apply_relu)
# ---------------------------------------------------------------------------
def fc_forward(x, layers, *, eps=1e-5):
    for (w, b, g, bt, act) in layers:
        x = conv2d_forward(x, w, b, g, bt, eps=eps, apply_relu=bool(act))
    return x


# ---------------------------------------------------------------------------
# Pure-JAX references of the PyTorch forward (verification only).
# ---------------------------------------------------------------------------
def _conv2d_reference(x, weight, bias, gamma, beta, eps=1e-5, apply_relu=True):
    Cout, Cin = weight.shape[0], weight.shape[1]
    w2 = weight.reshape(Cout, Cin)
    y = jnp.einsum("btnc,oc->btno", x, w2) + bias.reshape(1, 1, 1, Cout)
    mean = jnp.mean(y, axis=(0, 1, 2), keepdims=True)
    var = jnp.mean((y - mean) ** 2, axis=(0, 1, 2), keepdims=True)
    y = (y - mean) * jax.lax.rsqrt(var + eps) * gamma + beta
    return jnp.maximum(y, 0.0) if apply_relu else y


def _fc_reference(x, layers, eps=1e-5):
    for (w, b, g, bt, act) in layers:
        x = _conv2d_reference(x, w, b, g, bt, eps=eps, apply_relu=bool(act))
    return x


if __name__ == "__main__":
    # Shapes implied by AdaptiveGraphLearner FC-style usage:
    # x: (batch, seq, num_nodes, input_dims)
    B, T, N = 2, 8, 16
    key = jax.random.PRNGKey(0)

    def make_layer(k, cin, cout):
        # conv weight (Cout, Cin, 1, 1) xavier_uniform, conv bias zeros,
        # BatchNorm2d gamma ones / beta zeros (module __init__).
        bound = math.sqrt(6.0 / (cin + cout))
        w = jax.random.uniform(k, (cout, cin, 1, 1), minval=-bound,
                               maxval=bound, dtype=jnp.float32)
        return (w, jnp.zeros((cout,), jnp.float32),
                jnp.ones((cout,), jnp.float32), jnp.zeros((cout,), jnp.float32))

    kx, k1, k2, k3 = jax.random.split(key, 4)
    x = jax.random.normal(kx, (B, T, N, 4), dtype=jnp.float32)

    # Single conv2d_ layer (4 -> 32, ReLU), i.e. FC(4, 32, F.relu).
    w, b, g, bt = make_layer(k1, 4, 32)
    out = jax.block_until_ready(conv2d_forward(x, w, b, g, bt))
    ref = _conv2d_reference(x, w, b, g, bt)
    assert out.shape == (B, T, N, 32)
    assert jnp.allclose(out, ref, atol=1e-4, rtol=1e-4), "conv2d_ mismatch"

    # FC chain: [4 -> 16 (ReLU), 16 -> 32 (no activation)].
    layers = [(*make_layer(k2, 4, 16), True),
              (*make_layer(k3, 16, 32), False)]
    out_fc = jax.block_until_ready(fc_forward(x, layers))
    ref_fc = _fc_reference(x, layers)
    assert out_fc.shape == (B, T, N, 32)
    assert jnp.allclose(out_fc, ref_fc, atol=1e-4, rtol=1e-4), "FC mismatch"

    print("KERNEL_OK")
</pallas_src>

<mosaic_0001>
module attributes {stable_mosaic.version = 11 : i64} {
  func.func @_stats_kernel(%arg0: i32, %arg1: memref<8x128xf32, #tpu.memory_space<vmem>>, %arg2: memref<128x1024xf32, #tpu.memory_space<vmem>>, %arg3: memref<1x1x1024xf32, #tpu.memory_space<vmem>>, %arg4: memref<1x1x1024xf32, #tpu.memory_space<vmem>>) attributes {dimension_semantics = [#tpu.dimension_semantics<parallel>], iteration_bounds = array<i64: 1>, scalar_prefetch = 0 : i64, scratch_operands = 0 : i64, tpu.core_type = #tpu.core_type<tc>, window_params = [{transform_indices = @transform_0, window_bounds = array<i64: 8, 128>}, {pipeline_mode = #tpu.pipeline_mode<synchronous>, transform_indices = @transform_1, window_bounds = array<i64: 128, 1024>}, {transform_indices = @transform_2, window_bounds = array<i64: 1, 1, 1024>}, {transform_indices = @transform_3, window_bounds = array<i64: 1, 1, 1024>}]} {
    %c0 = arith.constant 0 : index
    %c0_0 = arith.constant 0 : index
    %0 = vector.load %arg1[%c0, %c0_0] : memref<8x128xf32, #tpu.memory_space<vmem>>, vector<8x128xf32>
    %c0_1 = arith.constant 0 : index
    %c0_2 = arith.constant 0 : index
    %1 = vector.load %arg2[%c0_1, %c0_2] : memref<128x1024xf32, #tpu.memory_space<vmem>>, vector<128x1024xf32>
    %cst = arith.constant dense<0.000000e+00> : vector<8x1024xf32>
    %2 = tpu.matmul %0, %1, %cst {dimension_numbers = #tpu.dot_dimension_numbers<[1], [0], [0], [1], [0, 0, 1, 1], [], []>} : vector<8x128xf32>, vector<128x1024xf32>, vector<8x1024xf32> -> vector<8x1024xf32>
    %cst_3 = arith.constant dense<0.000000e+00> : vector<1024xf32>
    %3 = vector.multi_reduction <add>, %2, %cst_3 [0] : vector<8x1024xf32> to vector<1024xf32>
    %4 = vector.shape_cast %3 : vector<1024xf32> to vector<1x1024xf32>
    %5 = arith.mulf %2, %2 : vector<8x1024xf32>
    %cst_4 = arith.constant dense<0.000000e+00> : vector<1024xf32>
    %6 = vector.multi_reduction <add>, %5, %cst_4 [0] : vector<8x1024xf32> to vector<1024xf32>
    %7 = vector.shape_cast %6 : vector<1024xf32> to vector<1x1024xf32>
    %8 = vector.shape_cast %4 : vector<1x1024xf32> to vector<1x1x1024xf32>
    %c0_5 = arith.constant 0 : index
    %c0_6 = arith.constant 0 : index
    %c0_7 = arith.constant 0 : index
    %9 = vector.load %arg3[%c0_5, %c0_6, %c0_7] : memref<1x1x1024xf32, #tpu.memory_space<vmem>>, vector<1x1x1024xf32>
    tpu.vector_store %arg3[%c0_5, %c0_6, %c0_7], %8 {strides = array<i32>} : memref<1x1x1024xf32, #tpu.memory_space<vmem>>, vector<1x1x1024xf32>,
    %10 = vector.shape_cast %7 : vector<1x1024xf32> to vector<1x1x1024xf32>
    %c0_8 = arith.constant 0 : index
    %c0_9 = arith.constant 0 : index
    %c0_10 = arith.constant 0 : index
    %11 = vector.load %arg4[%c0_8, %c0_9, %c0_10] : memref<1x1x1024xf32, #tpu.memory_space<vmem>>, vector<1x1x1024xf32>
    tpu.vector_store %arg4[%c0_8, %c0_9, %c0_10], %10 {strides = array<i32>} : memref<1x1x1024xf32, #tpu.memory_space<vmem>>, vector<1x1x1024xf32>,
    return
  }
  func.func @transform_0(%arg0: i32) -> (i32, i32) {
    %c0_i32 = arith.constant 0 : i32
    %c0_i32_0 = arith.constant 0 : i32
    return %arg0, %c0_i32 : i32, i32
  }
  func.func @transform_1(%arg0: i32) -> (i32, i32) {
    %c0_i32 = arith.constant 0 : i32
    %c0_i32_0 = arith.constant 0 : i32
    %c0_i32_1 = arith.constant 0 : i32
    return %c0_i32, %c0_i32_0 : i32, i32
  }
  func.func @transform_2(%arg0: i32) -> (i32, i32, i32) {
    %c0_i32 = arith.constant 0 : i32
    %c0_i32_0 = arith.constant 0 : i32
    %c0_i32_1 = arith.constant 0 : i32
    return %arg0, %c0_i32, %c0_i32_0 : i32, i32, i32
  }
  func.func @transform_3(%arg0: i32) -> (i32, i32, i32) {
    %c0_i32 = arith.constant 0 : i32
    %c0_i32_0 = arith.constant 0 : i32
    %c0_i32_1 = arith.constant 0 : i32
    return %arg0, %c0_i32, %c0_i32_0 : i32, i32, i32
  }
}

module attributes {stable_mosaic.version = 11 : i64} {
  func.func @_fused_matmul_bn_kernel(%arg0: i32, %arg1: memref<8x128xf32, #tpu.memory_space<vmem>>, %arg2: memref<128x1024xf32, #tpu.memory_space<vmem>>, %arg3: memref<1x1024xf32, #tpu.memory_space<vmem>>, %arg4: memref<1x1024xf32, #tpu.memory_space<vmem>>, %arg5: memref<8x1024xf32, #tpu.memory_space<vmem>>) attributes {dimension_semantics = [#tpu.dimension_semantics<parallel>], iteration_bounds = array<i64: 1>, scalar_prefetch = 0 : i64, scratch_operands = 0 : i64, tpu.core_type = #tpu.core_type<tc>, window_params = [{transform_indices = @transform_0, window_bounds = array<i64: 8, 128>}, {pipeline_mode = #tpu.pipeline_mode<synchronous>, transform_indices = @transform_1, window_bounds = array<i64: 128, 1024>}, {pipeline_mode = #tpu.pipeline_mode<synchronous>, transform_indices = @transform_2, window_bounds = array<i64: 1, 1024>}, {pipeline_mode = #tpu.pipeline_mode<synchronous>, transform_indices = @transform_3, window_bounds = array<i64: 1, 1024>}, {transform_indices = @transform_4, window_bounds = array<i64: 8, 1024>}]} {
    %c0 = arith.constant 0 : index
    %c0_0 = arith.constant 0 : index
    %0 = vector.load %arg1[%c0, %c0_0] : memref<8x128xf32, #tpu.memory_space<vmem>>, vector<8x128xf32>
    %c0_1 = arith.constant 0 : index
    %c0_2 = arith.constant 0 : index
    %1 = vector.load %arg2[%c0_1, %c0_2] : memref<128x1024xf32, #tpu.memory_space<vmem>>, vector<128x1024xf32>
    %cst = arith.constant dense<0.000000e+00> : vector<8x1024xf32>
    %2 = tpu.matmul %0, %1, %cst {dimension_numbers = #tpu.dot_dimension_numbers<[1], [0], [0], [1], [0, 0, 1, 1], [], []>} : vector<8x128xf32>, vector<128x1024xf32>, vector<8x1024xf32> -> vector<8x1024xf32>
    %c0_3 = arith.constant 0 : index
    %c0_4 = arith.constant 0 : index
    %3 = vector.load %arg3[%c0_3, %c0_4] : memref<1x1024xf32, #tpu.memory_space<vmem>>, vector<1x1024xf32>
    %4 = vector.broadcast %3 : vector<1x1024xf32> to vector<8x1024xf32>
    %5 = arith.mulf %2, %4 : vector<8x1024xf32>
    %c0_5 = arith.constant 0 : index
    %c0_6 = arith.constant 0 : index
    %6 = vector.load %arg4[%c0_5, %c0_6] : memref<1x1024xf32, #tpu.memory_space<vmem>>, vector<1x1024xf32>
    %7 = vector.broadcast %6 : vector<1x1024xf32> to vector<8x1024xf32>
    %8 = arith.addf %5, %7 : vector<8x1024xf32>
    %cst_7 = arith.constant 0.000000e+00 : f32
    %9 = vector.broadcast %cst_7 : f32 to vector<8x1024xf32>
    %10 = arith.maximumf %8, %9 : vector<8x1024xf32>
    %c0_8 = arith.constant 0 : index
    %c0_9 = arith.constant 0 : index
    %11 = vector.load %arg5[%c0_8, %c0_9] : memref<8x1024xf32, #tpu.memory_space<vmem>>, vector<8x1024xf32>
    tpu.vector_store %arg5[%c0_8, %c0_9], %10 {strides = array<i32>} : memref<8x1024xf32, #tpu.memory_space<vmem>>, vector<8x1024xf32>,
    return
  }
  func.func @transform_0(%arg0: i32) -> (i32, i32) {
    %c0_i32 = arith.constant 0 : i32
    %c0_i32_0 = arith.constant 0 : i32
    return %arg0, %c0_i32 : i32, i32
  }
  func.func @transform_1(%arg0: i32) -> (i32, i32) {
    %c0_i32 = arith.constant 0 : i32
    %c0_i32_0 = arith.constant 0 : i32
    %c0_i32_1 = arith.constant 0 : i32
    return %c0_i32, %c0_i32_0 : i32, i32
  }
  func.func @transform_2(%arg0: i32) -> (i32, i32) {
    %c0_i32 = arith.constant 0 : i32
    %c0_i32_0 = arith.constant 0 : i32
    %c0_i32_1 = arith.constant 0 : i32
    return %c0_i32, %c0_i32_0 : i32, i32
  }
  func.func @transform_3(%arg0: i32) -> (i32, i32) {
    %c0_i32 = arith.constant 0 : i32
    %c0_i32_0 = arith.constant 0 : i32
    %c0_i32_1 = arith.constant 0 : i32
    return %c0_i32, %c0_i32_0 : i32, i32
  }
  func.func @transform_4(%arg0: i32) -> (i32, i32) {
    %c0_i32 = arith.constant 0 : i32
    %c0_i32_0 = arith.constant 0 : i32
    return %arg0, %c0_i32 : i32, i32
  }
}

</mosaic_0001>

<bundles_post_ra>
// kernel: tile.13
= control target key start
LH: loop header
LB: loop body
LE: loop exit
PB: predicated region body
PF: predicated region fallthrough
CT: control target
= control target key end

     0   :  { %s40_s0 = inlined_call_operand.vmem [shape: f32[32], index: 0, kind: input, shape index: {}]   ;;  %s41_s1 = inlined_call_operand.vmem [shape: f32[32,32], index: 1, kind: output, shape index: {}]  }
   0x1   :  { %v4_v0 = vld [vmem:[%s40_s0] ss:$0 sm:$0xff] }
   0x2   :  { %5 = vst [vmem:[%s41_s1] sm:$0xff] %v4_v0 }
   0x3   :  { %12 = vst [vmem:[%s41_s1 + $0x8] sm:$0xff] %v4_v0 }
   0x4   :  { %13 = vst [vmem:[%s41_s1 + $0x10] sm:$0xff] %v4_v0 }
   0x5   :  { %14 = vst [vmem:[%s41_s1 + $0x18] sm:$0xff] %v4_v0 }

// kernel: tile.14
= control target key start
LH: loop header
LB: loop body
LE: loop exit
PB: predicated region body
PF: predicated region fallthrough
CT: control target
= control target key end

     0   :  { %s88_s8 = smov 96   ;;  %s89_s11 = smov 32   ;;  %vm3_vm0 = vcmask 261120   ;;  %vm10_vm1 = vcmask 1048320   ;;  %vm17_vm2 = vcmask 785920   ;;  %vm24_vm3 = vcmask 523520   ;;  %s137_s0 = inlined_call_operand.vmem [shape: f32[32,32], index: 0, kind: input, shape index: {}]   ;;  %s138_s1 = inlined_call_operand.vmem [shape: f32[1,1024], index: 1, kind: output, shape index: {}]  }
   0x1   :  { %v75_v0 = vld [vmem:[%s137_s0 + $0x3] ss:$4 sm:$0xff]   ;;  %v77_v1 = vld [vmem:[%s137_s0 + $0x1] ss:$4 sm:$0xff]   ;;  %v76_v2 = vld [vmem:[%s137_s0 + $0x2] ss:$4 sm:$0xff]  }
   0x2   :  { %8 = vrot.lane.b32.xlu0 %v75_v0, %s88_s8  ;;  %22 = vrot.lane.b32.xlu1 %v77_v1, %s89_s11  ;;  %s90_s14 = smov 64   ;;  %v2_v3 = vld [vmem:[%s137_s0] ss:$4 sm:$0xff]  }
   0x3   :  { %4 = vst.msk [vmem:[#allocation0] ss:$8 sm:$0xf] %vm3_vm0, %v2_v3  }
   0x4   :  { %5 = vst.msk [vmem:[#allocation0] ss:$8 sm:$0xf0] %vm3_vm0, %v2_v3  }
   0xa   :  { %15 = vrot.lane.b32.xlu0 %v76_v2, %s90_s14 }
  0x74   :  { %v9_v4 = vpop.permute.xlu0 %8   ;;  %v23_v5 = vpop.permute.xlu1 %22  }
  0x75   :  { %11 = vst.msk [vmem:[#allocation0] ss:$8 sm:$0xf] %vm10_vm1, %v9_v4  }
  0x76   :  { %12 = vst.msk [vmem:[#allocation0] ss:$8 sm:$0xf0] %vm10_vm1, %v9_v4  }
  0x7c   :  { %v16_v6 = vpop.permute.xlu0 %15  }
  0x7d   :  { %18 = vst.msk [vmem:[#allocation0] ss:$8 sm:$0xf] %vm17_vm2, %v16_v6  }
  0x7e   :  { %19 = vst.msk [vmem:[#allocation0] ss:$8 sm:$0xf0] %vm17_vm2, %v16_v6  }
  0x7f   :  { %25 = vst.msk [vmem:[#allocation0] ss:$8 sm:$0xf] %vm24_vm3, %v23_v5  }
  0x80   :  { %26 = vst.msk [vmem:[#allocation0] ss:$8 sm:$0xf0] %vm24_vm3, %v23_v5  }
  0x86   :  { %v29_v7 = vld [vmem:[#allocation0] sm:$0x1]  ;;  %v34_v8 = vld [vmem:[#allocation0 + $0x8] sm:$0x1]  ;;  %v40_v9 = vld [vmem:[#allocation0 + $0x10] sm:$0x1] }
  0x87   :  { %32 = vst [vmem:[%s138_s1] sm:$0x1] %v29_v7  ;;  %v46_v10 = vld [vmem:[#allocation0 + $0x18] sm:$0x1]  ;;  %v52_v11 = vld [vmem:[#allocation0 + $0x20] sm:$0x1] }
  0x88   :  { %78 = vst [vmem:[%s138_s1 + $0x1] sm:$0x1] %v34_v8  ;;  %v58_v12 = vld [vmem:[#allocation0 + $0x28] sm:$0x1]  ;;  %v64_v13 = vld [vmem:[#allocation0 + $0x30] sm:$0x1] }
  0x89   :  { %79 = vst [vmem:[%s138_s1 + $0x2] sm:$0x1] %v40_v9  ;;  %v70_v14 = vld [vmem:[#allocation0 + $0x38] sm:$0x1] }
  0x8a   :  { %80 = vst [vmem:[%s138_s1 + $0x3] sm:$0x1] %v46_v10 }
  0x8b   :  { %81 = vst [vmem:[%s138_s1 + $0x4] sm:$0x1] %v52_v11 }
  0x8c   :  { %82 = vst [vmem:[%s138_s1 + $0x5] sm:$0x1] %v58_v12 }
  0x8d   :  { %83 = vst [vmem:[%s138_s1 + $0x6] sm:$0x1] %v64_v13 }
  0x8e   :  { %84 = vst [vmem:[%s138_s1 + $0x7] sm:$0x1] %v70_v14 }

// kernel: conv2d_forward.2
= control target key start
LH: loop header
LB: loop body
LE: loop exit
PB: predicated region body
PF: predicated region fallthrough
CT: control target
= control target key end

     0   :  { %vm423_vm0 = vcmask 1042434   ;;  %vm421_vm1 = vcmask 1040384   ;;  %vm427_vm2 = vcmask 1044484   ;;  %vm429_vm3 = vcmask 1046534   ;;  %s924_s1 = inlined_call_operand.vmem [shape: f32[128,1024], index: 1, kind: input, shape index: {}]   ;;  %s925_s0 = inlined_call_operand.vmem [shape: f32[8,128], index: 0, kind: input, shape index: {}]   ;;  %s926_s2 = inlined_call_operand.vmem [shape: f32[1,1,1024], index: 2, kind: output, shape index: {0}]   ;;  %s927_s3 = inlined_call_operand.vmem [shape: f32[1,1,1024], index: 3, kind: output, shape index: {1}]  }
   0x1   :  { %v134_v0 = vld [vmem:[%s924_s1 + $0x3c0] sm:$0xff]  ;;  %v135_v1 = vld [vmem:[%s924_s1 + $0x3c8] sm:$0xff]  ;;  %v136_v2 = vld [vmem:[%s924_s1 + $0x3d0] sm:$0xff]  ;;  %vm425_vm4 = vcmask 1041408   ;;  %vm431_vm5 = vcmask 1045508   ;;  %vm433_vm6 = vcmask 1043456  }
   0x2   :  { %142 = vmatpush.msra.mxu0 %v134_v0  ;;  %162 = vmatpush.msra.mxu1 %v135_v1  ;;  %v137_v3 = vld [vmem:[%s924_s1 + $0x3d8] sm:$0xff]  ;;  %v126_v4 = vld [vmem:[%s924_s1 + $0x380] sm:$0xff]  ;;  %v127_v5 = vld [vmem:[%s924_s1 + $0x388] sm:$0xff] }
   0x3   :  { %182 = vmatpush.msra.mxu2 %v136_v2  ;;  %202 = vmatpush.msra.mxu3 %v137_v3  ;;  %v128_v6 = vld [vmem:[%s924_s1 + $0x390] sm:$0xff]  ;;  %v129_v7 = vld [vmem:[%s924_s1 + $0x398] sm:$0xff]  ;;  %v118_v8 = vld [vmem:[%s924_s1 + $0x340] sm:$0xff] }
   0x4   :  { %143 = vmatpush.msra.mxu0 %v126_v4  ;;  %163 = vmatpush.msra.mxu1 %v127_v5  ;;  %v119_v9 = vld [vmem:[%s924_s1 + $0x348] sm:$0xff]  ;;  %v120_v10 = vld [vmem:[%s924_s1 + $0x350] sm:$0xff]  ;;  %v121_v11 = vld [vmem:[%s924_s1 + $0x358] sm:$0xff] }
   0x5   :  { %183 = vmatpush.msra.mxu2 %v128_v6  ;;  %203 = vmatpush.msra.mxu3 %v129_v7  ;;  %v110_v12 = vld [vmem:[%s924_s1 + $0x300] sm:$0xff]  ;;  %v111_v13 = vld [vmem:[%s924_s1 + $0x308] sm:$0xff]  ;;  %v112_v14 = vld [vmem:[%s924_s1 + $0x310] sm:$0xff] }
   0x6   :  { %144 = vmatpush.msra.mxu0 %v118_v8  ;;  %164 = vmatpush.msra.mxu1 %v119_v9  ;;  %v113_v15 = vld [vmem:[%s924_s1 + $0x318] sm:$0xff]  ;;  %v102_v16 = vld [vmem:[%s924_s1 + $0x2c0] sm:$0xff]  ;;  %v103_v17 = vld [vmem:[%s924_s1 + $0x2c8] sm:$0xff] }
   0x7   :  { %184 = vmatpush.msra.mxu2 %v120_v10  ;;  %204 = vmatpush.msra.mxu3 %v121_v11  ;;  %v104_v18 = vld [vmem:[%s924_s1 + $0x2d0] sm:$0xff]  ;;  %v105_v19 = vld [vmem:[%s924_s1 + $0x2d8] sm:$0xff]  ;;  %v94_v20 = vld [vmem:[%s924_s1 + $0x280] sm:$0xff] }
   0x8   :  { %145 = vmatpush.msra.mxu0 %v110_v12  ;;  %165 = vmatpush.msra.mxu1 %v111_v13  ;;  %v95_v21 = vld [vmem:[%s924_s1 + $0x288] sm:$0xff]  ;;  %v96_v22 = vld [vmem:[%s924_s1 + $0x290] sm:$0xff]  ;;  %v97_v23 = vld [vmem:[%s924_s1 + $0x298] sm:$0xff] }
   0x9   :  { %185 = vmatpush.msra.mxu2 %v112_v14  ;;  %205 = vmatpush.msra.mxu3 %v113_v15  ;;  %v86_v24 = vld [vmem:[%s924_s1 + $0x240] sm:$0xff]  ;;  %v87_v25 = vld [vmem:[%s924_s1 + $0x248] sm:$0xff]  ;;  %v88_v26 = vld [vmem:[%s924_s1 + $0x250] sm:$0xff] }
   0xa   :  { %146 = vmatpush.msra.mxu0 %v102_v16  ;;  %166 = vmatpush.msra.mxu1 %v103_v17  ;;  %v89_v27 = vld [vmem:[%s924_s1 + $0x258] sm:$0xff]  ;;  %v78_v28 = vld [vmem:[%s924_s1 + $0x200] sm:$0xff]  ;;  %v79_v29 = vld [vmem:[%s924_s1 + $0x208] sm:$0xff] }
   0xb   :  { %186 = vmatpush.msra.mxu2 %v104_v18  ;;  %206 = vmatpush.msra.mxu3 %v105_v19  ;;  %v80_v30 = vld [vmem:[%s924_s1 + $0x210] sm:$0xff]  ;;  %v81_v31 = vld [vmem:[%s924_s1 + $0x218] sm:$0xff]  ;;  %v70_v32 = vld [vmem:[%s924_s1 + $0x1c0] sm:$0xff] }
   0xc   :  { %147 = vmatpush.msra.mxu0 %v94_v20  ;;  %167 = vmatpush.msra.mxu1 %v95_v21  ;;  %v71_v33 = vld [vmem:[%s924_s1 + $0x1c8] sm:$0xff]  ;;  %v72_v34 = vld [vmem:[%s924_s1 + $0x1d0] sm:$0xff]  ;;  %v73_v35 = vld [vmem:[%s924_s1 + $0x1d8] sm:$0xff] }
   0xd   :  { %187 = vmatpush.msra.mxu2 %v96_v22  ;;  %207 = vmatpush.msra.mxu3 %v97_v23  ;;  %v62_v36 = vld [vmem:[%s924_s1 + $0x180] sm:$0xff]  ;;  %v63_v37 = vld [vmem:[%s924_s1 + $0x188] sm:$0xff]  ;;  %v64_v38 = vld [vmem:[%s924_s1 + $0x190] sm:$0xff] }
   0xe   :  { %148 = vmatpush.msra.mxu0 %v86_v24  ;;  %168 = vmatpush.msra.mxu1 %v87_v25  ;;  %v65_v39 = vld [vmem:[%s924_s1 + $0x198] sm:$0xff]  ;;  %v54_v40 = vld [vmem:[%s924_s1 + $0x140] sm:$0xff]  ;;  %v55_v41 = vld [vmem:[%s924_s1 + $0x148] sm:$0xff] }
   0xf   :  { %188 = vmatpush.msra.mxu2 %v88_v26  ;;  %208 = vmatpush.msra.mxu3 %v89_v27  ;;  %v56_v42 = vld [vmem:[%s924_s1 + $0x150] sm:$0xff]  ;;  %v57_v43 = vld [vmem:[%s924_s1 + $0x158] sm:$0xff]  ;;  %v46_v44 = vld [vmem:[%s924_s1 + $0x100] sm:$0xff] }
  0x10   :  { %149 = vmatpush.msra.mxu0 %v78_v28  ;;  %169 = vmatpush.msra.mxu1 %v79_v29  ;;  %v47_v45 = vld [vmem:[%s924_s1 + $0x108] sm:$0xff]  ;;  %v48_v46 = vld [vmem:[%s924_s1 + $0x110] sm:$0xff]  ;;  %v49_v47 = vld [vmem:[%s924_s1 + $0x118] sm:$0xff] }
  0x11   :  { %189 = vmatpush.msra.mxu2 %v80_v30  ;;  %209 = vmatpush.msra.mxu3 %v81_v31  ;;  %v38_v48 = vld [vmem:[%s924_s1 + $0xc0] sm:$0xff]  ;;  %v39_v49 = vld [vmem:[%s924_s1 + $0xc8] sm:$0xff]  ;;  %v40_v50 = vld [vmem:[%s924_s1 + $0xd0] sm:$0xff] }
  0x12   :  { %150 = vmatpush.msra.mxu0 %v70_v32  ;;  %170 = vmatpush.msra.mxu1 %v71_v33  ;;  %v41_v51 = vld [vmem:[%s924_s1 + $0xd8] sm:$0xff]  ;;  %v30_v52 = vld [vmem:[%s924_s1 + $0x80] sm:$0xff]  ;;  %v31_v53 = vld [vmem:[%s924_s1 + $0x88] sm:$0xff] }
  0x13   :  { %190 = vmatpush.msra.mxu2 %v72_v34  ;;  %210 = vmatpush.msra.mxu3 %v73_v35  ;;  %v32_v54 = vld [vmem:[%s924_s1 + $0x90] sm:$0xff]  ;;  %v33_v55 = vld [vmem:[%s924_s1 + $0x98] sm:$0xff]  ;;  %v22_v56 = vld [vmem:[%s924_s1 + $0x40] sm:$0xff] }
  0x14   :  { %151 = vmatpush.msra.mxu0 %v62_v36  ;;  %171 = vmatpush.msra.mxu1 %v63_v37  ;;  %v23_v57 = vld [vmem:[%s924_s1 + $0x48] sm:$0xff]  ;;  %v24_v58 = vld [vmem:[%s924_s1 + $0x50] sm:$0xff]  ;;  %v25_v59 = vld [vmem:[%s924_s1 + $0x58] sm:$0xff] }
  0x15   :  { %191 = vmatpush.msra.mxu2 %v64_v38  ;;  %211 = vmatpush.msra.mxu3 %v65_v39  ;;  %v14_v60 = vld [vmem:[%s924_s1] sm:$0xff]  ;;  %v15_v61 = vld [vmem:[%s924_s1 + $0x8] sm:$0xff]  ;;  %v16_v62 = vld [vmem:[%s924_s1 + $0x10] sm:$0xff] }
  0x16   :  { %152 = vmatpush.msra.mxu0 %v54_v40  ;;  %172 = vmatpush.msra.mxu1 %v55_v41  ;;  %v17_v63 = vld [vmem:[%s924_s1 + $0x18] sm:$0xff]  ;;  %v138_v0 = vld [vmem:[%s924_s1 + $0x3e0] sm:$0xff]  ;;  %v139_v1 = vld [vmem:[%s924_s1 + $0x3e8] sm:$0xff] }
  0x17   :  { %192 = vmatpush.msra.mxu2 %v56_v42  ;;  %212 = vmatpush.msra.mxu3 %v57_v43  ;;  %v140_v2 = vld [vmem:[%s924_s1 + $0x3f0] sm:$0xff]  ;;  %v141_v3 = vld [vmem:[%s924_s1 + $0x3f8] sm:$0xff]  ;;  %v130_v4 = vld [vmem:[%s924_s1 + $0x3a0] sm:$0xff] }
  0x18   :  { %153 = vmatpush.msra.mxu0 %v46_v44  ;;  %173 = vmatpush.msra.mxu1 %v47_v45  ;;  %v131_v5 = vld [vmem:[%s924_s1 + $0x3a8] sm:$0xff]  ;;  %v132_v6 = vld [vmem:[%s924_s1 + $0x3b0] sm:$0xff]  ;;  %v133_v7 = vld [vmem:[%s924_s1 + $0x3b8] sm:$0xff] }
  0x19   :  { %193 = vmatpush.msra.mxu2 %v48_v46  ;;  %213 = vmatpush.msra.mxu3 %v49_v47  ;;  %v122_v8 = vld [vmem:[%s924_s1 + $0x360] sm:$0xff]  ;;  %v123_v9 = vld [vmem:[%s924_s1 + $0x368] sm:$0xff]  ;;  %v124_v10 = vld [vmem:[%s924_s1 + $0x370] sm:$0xff] }
  0x1a   :  { %154 = vmatpush.msra.mxu0 %v38_v48  ;;  %174 = vmatpush.msra.mxu1 %v39_v49  ;;  %v125_v11 = vld [vmem:[%s924_s1 + $0x378] sm:$0xff]  ;;  %v114_v12 = vld [vmem:[%s924_s1 + $0x320] sm:$0xff]  ;;  %v115_v13 = vld [vmem:[%s924_s1 + $0x328] sm:$0xff] }
  0x1b   :  { %194 = vmatpush.msra.mxu2 %v40_v50  ;;  %214 = vmatpush.msra.mxu3 %v41_v51  ;;  %v116_v14 = vld [vmem:[%s924_s1 + $0x330] sm:$0xff]  ;;  %v117_v15 = vld [vmem:[%s924_s1 + $0x338] sm:$0xff]  ;;  %v106_v16 = vld [vmem:[%s924_s1 + $0x2e0] sm:$0xff] }
  0x1c   :  { %155 = vmatpush.msra.mxu0 %v30_v52  ;;  %175 = vmatpush.msra.mxu1 %v31_v53  ;;  %v107_v17 = vld [vmem:[%s924_s1 + $0x2e8] sm:$0xff]  ;;  %v108_v18 = vld [vmem:[%s924_s1 + $0x2f0] sm:$0xff]  ;;  %v109_v19 = vld [vmem:[%s924_s1 + $0x2f8] sm:$0xff] }
  0x1d   :  { %195 = vmatpush.msra.mxu2 %v32_v54  ;;  %215 = vmatpush.msra.mxu3 %v33_v55  ;;  %v98_v20 = vld [vmem:[%s924_s1 + $0x2a0] sm:$0xff]  ;;  %v99_v21 = vld [vmem:[%s924_s1 + $0x2a8] sm:$0xff]  ;;  %v100_v22 = vld [vmem:[%s924_s1 + $0x2b0] sm:$0xff] }
  0x1e   :  { %156 = vmatpush.msra.mxu0 %v22_v56  ;;  %176 = vmatpush.msra.mxu1 %v23_v57  ;;  %v101_v23 = vld [vmem:[%s924_s1 + $0x2b8] sm:$0xff]  ;;  %v90_v24 = vld [vmem:[%s924_s1 + $0x260] sm:$0xff]  ;;  %v91_v25 = vld [vmem:[%s924_s1 + $0x268] sm:$0xff] }
  0x1f   :  { %196 = vmatpush.msra.mxu2 %v24_v58  ;;  %216 = vmatpush.msra.mxu3 %v25_v59  ;;  %v92_v26 = vld [vmem:[%s924_s1 + $0x270] sm:$0xff]  ;;  %v93_v27 = vld [vmem:[%s924_s1 + $0x278] sm:$0xff]  ;;  %v82_v28 = vld [vmem:[%s924_s1 + $0x220] sm:$0xff] }
  0x20   :  { %157 = vmatpush.msra.mxu0 %v14_v60  ;;  %177 = vmatpush.msra.mxu1 %v15_v61  ;;  %v83_v29 = vld [vmem:[%s924_s1 + $0x228] sm:$0xff]  ;;  %v84_v30 = vld [vmem:[%s924_s1 + $0x230] sm:$0xff]  ;;  %v85_v31 = vld [vmem:[%s924_s1 + $0x238] sm:$0xff] }
  0x21   :  { %197 = vmatpush.msra.mxu2 %v16_v62  ;;  %217 = vmatpush.msra.mxu3 %v17_v63  ;;  %v780_v32 = vld [vmem:[%s925_s0] sm:$0xff]  ;;  %v75_v34 = vld [vmem:[%s924_s1 + $0x1e8] sm:$0xff]  ;;  %v76_v35 = vld [vmem:[%s924_s1 + $0x1f0] sm:$0xff] }
  0x22   :  { %222 = vmatpush.msrb.mxu0 %v138_v0  ;;  %242 = vmatpush.msrb.mxu1 %v139_v1  ;;  %v74_v33 = vld [vmem:[%s924_s1 + $0x1e0] sm:$0xff]  ;;  %v77_v36 = vld [vmem:[%s924_s1 + $0x1f8] sm:$0xff]  ;;  %v67_v38 = vld [vmem:[%s924_s1 + $0x1a8] sm:$0xff] }
  0x23   :  { %262 = vmatpush.msrb.mxu2 %v140_v2  ;;  %282 = vmatpush.msrb.mxu3 %v141_v3  ;;  %v66_v37 = vld [vmem:[%s924_s1 + $0x1a0] sm:$0xff]  ;;  %v68_v39 = vld [vmem:[%s924_s1 + $0x1b0] sm:$0xff]  ;;  %v69_v40 = vld [vmem:[%s924_s1 + $0x1b8] sm:$0xff] }
  0x24   :  { %223 = vmatpush.msrb.mxu0 %v130_v4  ;;  %243 = vmatpush.msrb.mxu1 %v131_v5  ;;  %v58_v41 = vld [vmem:[%s924_s1 + $0x160] sm:$0xff]  ;;  %v59_v42 = vld [vmem:[%s924_s1 + $0x168] sm:$0xff]  ;;  %v60_v43 = vld [vmem:[%s924_s1 + $0x170] sm:$0xff] }
  0x25   :  { %263 = vmatpush.msrb.mxu2 %v132_v6  ;;  %283 = vmatpush.msrb.mxu3 %v133_v7  ;;  %v61_v44 = vld [vmem:[%s924_s1 + $0x178] sm:$0xff]  ;;  %v50_v45 = vld [vmem:[%s924_s1 + $0x120] sm:$0xff]  ;;  %v51_v46 = vld [vmem:[%s924_s1 + $0x128] sm:$0xff] }
  0x26   :  { %224 = vmatpush.msrb.mxu0 %v122_v8  ;;  %244 = vmatpush.msrb.mxu1 %v123_v9  ;;  %v52_v47 = vld [vmem:[%s924_s1 + $0x130] sm:$0xff]  ;;  %v53_v48 = vld [vmem:[%s924_s1 + $0x138] sm:$0xff]  ;;  %v42_v49 = vld [vmem:[%s924_s1 + $0xe0] sm:$0xff] }
  0x27   :  { %264 = vmatpush.msrb.mxu2 %v124_v10  ;;  %284 = vmatpush.msrb.mxu3 %v125_v11  ;;  %v43_v50 = vld [vmem:[%s924_s1 + $0xe8] sm:$0xff]  ;;  %v44_v51 = vld [vmem:[%s924_s1 + $0xf0] sm:$0xff]  ;;  %v45_v52 = vld [vmem:[%s924_s1 + $0xf8] sm:$0xff] }
  0x28   :  { %225 = vmatpush.msrb.mxu0 %v114_v12  ;;  %245 = vmatpush.msrb.mxu1 %v115_v13  ;;  %v34_v53 = vld [vmem:[%s924_s1 + $0xa0] sm:$0xff]  ;;  %v35_v54 = vld [vmem:[%s924_s1 + $0xa8] sm:$0xff]  ;;  %v36_v55 = vld [vmem:[%s924_s1 + $0xb0] sm:$0xff] }
  0x29   :  { %265 = vmatpush.msrb.mxu2 %v116_v14  ;;  %285 = vmatpush.msrb.mxu3 %v117_v15  ;;  %v37_v56 = vld [vmem:[%s924_s1 + $0xb8] sm:$0xff]  ;;  %v26_v57 = vld [vmem:[%s924_s1 + $0x60] sm:$0xff]  ;;  %v27_v58 = vld [vmem:[%s924_s1 + $0x68] sm:$0xff] }
  0x2a   :  { %226 = vmatpush.msrb.mxu0 %v106_v16  ;;  %246 = vmatpush.msrb.mxu1 %v107_v17  ;;  %v28_v59 = vld [vmem:[%s924_s1 + $0x70] sm:$0xff]  ;;  %v29_v60 = vld [vmem:[%s924_s1 + $0x78] sm:$0xff]  ;;  %v18_v61 = vld [vmem:[%s924_s1 + $0x20] sm:$0xff] }
  0x2b   :  { %266 = vmatpush.msrb.mxu2 %v108_v18  ;;  %286 = vmatpush.msrb.mxu3 %v109_v19  ;;  %v19_v62 = vld [vmem:[%s924_s1 + $0x28] sm:$0xff]  ;;  %v20_v63 = vld [vmem:[%s924_s1 + $0x30] sm:$0xff]  ;;  %v21_v0 = vld [vmem:[%s924_s1 + $0x38] sm:$0xff] }
  0x2c   :  { %227 = vmatpush.msrb.mxu0 %v98_v20  ;;  %247 = vmatpush.msrb.mxu1 %v99_v21 }
  0x2d   :  { %267 = vmatpush.msrb.mxu2 %v100_v22  ;;  %287 = vmatpush.msrb.mxu3 %v101_v23 }
  0x2e   :  { %228 = vmatpush.msrb.mxu0 %v90_v24  ;;  %248 = vmatpush.msrb.mxu1 %v91_v25 }
  0x2f   :  { %268 = vmatpush.msrb.mxu2 %v92_v26  ;;  %288 = vmatpush.msrb.mxu3 %v93_v27 }
  0x30   :  { %229 = vmatpush.msrb.mxu0 %v82_v28  ;;  %249 = vmatpush.msrb.mxu1 %v83_v29 }
  0x31   :  { %269 = vmatpush.msrb.mxu2 %v84_v30  ;;  %289 = vmatpush.msrb.mxu3 %v85_v31 }
  0x32   :  { %198 = vmatmul.f32.vlgmr.msra.gmra.mxu2 %v780_v32  ;;  %218 = vmatmul.f32.vlgmr.msra.gmra.mxu3 %v780_v32 }
  0x33   :  { %230 = vmatpush.msrb.mxu0 %v74_v33  ;;  %250 = vmatpush.msrb.mxu1 %v75_v34 }
  0x34   :  { %270 = vmatpush.msrb.mxu2 %v76_v35  ;;  %290 = vmatpush.msrb.mxu3 %v77_v36 }
  0x35   :  { %231 = vmatpush.msrb.mxu0 %v66_v37  ;;  %251 = vmatpush.msrb.mxu1 %v67_v38 }
  0x36   :  { %271 = vmatpush.msrb.mxu2 %v68_v39  ;;  %291 = vmatpush.msrb.mxu3 %v69_v40 }
  0x37   :  { %232 = vmatpush.msrb.mxu0 %v58_v41  ;;  %252 = vmatpush.msrb.mxu1 %v59_v42 }
  0x38   :  { %272 = vmatpush.msrb.mxu2 %v60_v43  ;;  %292 = vmatpush.msrb.mxu3 %v61_v44 }
  0x39   :  { %178 = vmatmul.f32.vlgmr.msra.gmra.mxu1 %v780_v32  ;;  %233 = vmatpush.msrb.mxu0 %v50_v45 }
  0x3a   :  { %253 = vmatpush.msrb.mxu1 %v51_v46  ;;  %273 = vmatpush.msrb.mxu2 %v52_v47 }
  0x3b   :  { %293 = vmatpush.msrb.mxu3 %v53_v48  ;;  %158 = vmatmul.f32.vlgmr.msra.gmra.mxu0 %v780_v32 }
  0x3c   :  { %234 = vmatpush.msrb.mxu0 %v42_v49  ;;  %254 = vmatpush.msrb.mxu1 %v43_v50 }
  0x3d   :  { %274 = vmatpush.msrb.mxu2 %v44_v51  ;;  %294 = vmatpush.msrb.mxu3 %v45_v52 }
  0x3e   :  { %235 = vmatpush.msrb.mxu0 %v34_v53  ;;  %255 = vmatpush.msrb.mxu1 %v35_v54 }
  0x3f   :  { %275 = vmatpush.msrb.mxu2 %v36_v55  ;;  %295 = vmatpush.msrb.mxu3 %v37_v56 }
  0x40   :  { %236 = vmatpush.msrb.mxu0 %v26_v57  ;;  %256 = vmatpush.msrb.mxu1 %v27_v58 }
  0x41   :  { %276 = vmatpush.msrb.mxu2 %v28_v59  ;;  %296 = vmatpush.msrb.mxu3 %v29_v60 }
  0x42   :  { %237 = vmatpush.msrb.mxu0 %v18_v61  ;;  %257 = vmatpush.msrb.mxu1 %v19_v62 }
  0x43   :  { %277 = vmatpush.msrb.mxu2 %v20_v63  ;;  %297 = vmatpush.msrb.mxu3 %v21_v0 }
  0x44   :  { %238 = vmatmul.f32.vlgmr.msrb.gmra.mxu0 %v780_v32  ;;  %258 = vmatmul.f32.vlgmr.msrb.gmra.mxu1 %v780_v32 }
  0x45   :  { %278 = vmatmul.f32.vlgmr.msrb.gmra.mxu2 %v780_v32  ;;  %298 = vmatmul.f32.vlgmr.msrb.gmra.mxu3 %v780_v32 }
  0xb5   :  { %v199_v1 = vpop.f32.mrf.mxu2  ;;  %v219_v2 = vpop.f32.mrf.mxu3 }
  0xb6   :  { %v179_v3 = vpop.f32.mrf.mxu1  ;;  %v314_v4 = vrot.slane %v199_v1, 4  ;;  %v352_v5 = vmul.f32 %v199_v1, %v199_v1  ;;  %v320_v6 = vrot.slane %v219_v2, 4  ;;  %v353_v7 = vmul.f32 %v219_v2, %v219_v2 }
  0xb7   :  { %v308_v8 = vrot.slane %v179_v3, 4  ;;  %v351_v9 = vmul.f32 %v179_v3, %v179_v3 }
  0xb8   :  { %v315_v10 = vadd.f32 %v314_v4, %v199_v1  ;;  %v370_v11 = vrot.slane %v352_v5, 4  ;;  %v321_v12 = vadd.f32 %v320_v6, %v219_v2  ;;  %v376_v13 = vrot.slane %v353_v7, 4  ;;  %v159_v14 = vpop.f32.mrf.mxu0 }
  0xb9   :  { %v309_v15 = vadd.f32 %v308_v8, %v179_v3  ;;  %v364_v16 = vrot.slane %v351_v9, 4  ;;  %v302_v17 = vrot.slane %v159_v14, 4  ;;  %v350_v18 = vmul.f32 %v159_v14, %v159_v14 }
  0xba   :  { %v316_v19 = vrot.slane %v315_v10, 2  ;;  %v371_v20 = vadd.f32 %v370_v11, %v352_v5  ;;  %v322_v21 = vrot.slane %v321_v12, 2  ;;  %v377_v22 = vadd.f32 %v376_v13, %v353_v7 }
  0xbb   :  { %v310_v23 = vrot.slane %v309_v15, 2  ;;  %v365_v24 = vadd.f32 %v364_v16, %v351_v9  ;;  %v303_v25 = vadd.f32 %v302_v17, %v159_v14  ;;  %v358_v26 = vrot.slane %v350_v18, 4 }
  0xbc   :  { %v317_v27 = vadd.f32 %v316_v19, %v315_v10  ;;  %v372_v28 = vrot.slane %v371_v20, 2  ;;  %v323_v29 = vadd.f32 %v322_v21, %v321_v12  ;;  %v378_v30 = vrot.slane %v377_v22, 2 }
  0xbd   :  { %v311_v31 = vadd.f32 %v310_v23, %v309_v15  ;;  %v366_v32 = vrot.slane %v365_v24, 2  ;;  %v304_v33 = vrot.slane %v303_v25, 2  ;;  %v359_v34 = vadd.f32 %v358_v26, %v350_v18 }
  0xbe   :  { %v318_v35 = vrot.slane %v317_v27, 1  ;;  %v373_v36 = vadd.f32 %v372_v28, %v371_v20  ;;  %v324_v37 = vrot.slane %v323_v29, 1  ;;  %v379_v38 = vadd.f32 %v378_v30, %v377_v22 }
  0xbf   :  { %v312_v39 = vrot.slane %v311_v31, 1  ;;  %v367_v40 = vadd.f32 %v366_v32, %v365_v24  ;;  %v305_v41 = vadd.f32 %v304_v33, %v303_v25  ;;  %v360_v43 = vrot.slane %v359_v34, 2 }
  0xc0   :  { %v374_v42 = vrot.slane %v373_v36, 1  ;;  %v319_v44 = vadd.f32 %v318_v35, %v317_v27  ;;  %v380_v45 = vrot.slane %v379_v38, 1  ;;  %v325_v48 = vadd.f32 %v324_v37, %v323_v29 }
  0xc1   :  { %v239_v46 = vpop.f32.mrf.mxu0  ;;  %v368_v47 = vrot.slane %v367_v40, 1  ;;  %v886_v49 = vadd.f32 %v312_v39, %v311_v31  ;;  %v306_v50 = vrot.slane %v305_v41, 1  ;;  %v259_v51 = vpop.f32.mrf.mxu1  ;;  %v890_v53 = vadd.f32 %v360_v43, %v359_v34 }
  0xc2   :  { %v888_v52 = vadd.f32 %v374_v42, %v373_v36  ;;  %v326_v54 = vrot.slane %v239_v46, 4  ;;  %v415_v55 = vrot.slane %v319_v44, 6  ;;  %v892_v56 = vadd.f32 %v380_v45, %v379_v38 }
  0xc3   :  { %v354_v57 = vmul.f32 %v239_v46, %v239_v46  ;;  %v894_v58 = vadd.f32 %v368_v47, %v367_v40  ;;  %v416_v59 = vrot.slane %v325_v48, 5  ;;  %v332_v61 = vrot.slane %v259_v51, 4 }
  0xc4   :  { %v327_v60 = vadd.f32 %v326_v54, %v239_v46  ;;  %v414_v62 = vrot.slane %v886_v49, 7  ;;  %v307_v63 = vadd.f32 %v306_v50, %v305_v41  ;;  %v355_v1 = vmul.f32 %v259_v51, %v259_v51 }
  0xc5   :  { %v382_v0 = vrot.slane %v354_v57, 4  ;;  %v446_v2 = vrot.slane %v888_v52, 6  ;;  %v362_v3 = vrot.slane %v890_v53, 1  ;;  %v333_v5 = vadd.f32 %v332_v61, %v259_v51 }
  0xc6   :  { %v328_v4 = vrot.slane %v327_v60, 2  ;;  %v388_v9 = vrot.slane %v355_v1, 4  ;;  %v424_v28 = vsel %vm423_vm0, %v415_v55, %v416_v59  ;;  %v447_v40 = vrot.slane %v892_v56, 5 }
  0xc7   :  { %v383_v8 = vadd.f32 %v382_v0, %v354_v57  ;;  %v334_v13 = vrot.slane %v333_v5, 2  ;;  %v445_v44 = vrot.slane %v894_v58, 7  ;;  %v363_v48 = vadd.f32 %v362_v3, %v890_v53 }
  0xc8   :  { %v279_v6 = vpop.f32.mrf.mxu2  ;;  %v299_v7 = vpop.f32.mrf.mxu3  ;;  %v329_v12 = vadd.f32 %v328_v4, %v327_v60  ;;  %v389_v17 = vadd.f32 %v388_v9, %v355_v1  ;;  %v422_v56 = vsel %vm421_vm1, %v307_v63, %v414_v62  ;;  %v453_v53 = vsel %vm423_vm0, %v446_v2, %v447_v40 }
  0xc9   :  { %v338_v10 = vrot.slane %v279_v6, 4  ;;  %v356_v11 = vmul.f32 %v279_v6, %v279_v6  ;;  %v344_v14 = vrot.slane %v299_v7, 4  ;;  %v357_v15 = vmul.f32 %v299_v7, %v299_v7 }
  0xca   :  { %v384_v16 = vrot.slane %v383_v8, 2  ;;  %v330_v20 = vrot.slane %v329_v12, 1  ;;  %v335_v21 = vadd.f32 %v334_v13, %v333_v5  ;;  %v390_v25 = vrot.slane %v389_v17, 2 }
  0xcb   :  { %v339_v18 = vadd.f32 %v338_v10, %v279_v6  ;;  %v394_v19 = vrot.slane %v356_v11, 4  ;;  %v345_v22 = vadd.f32 %v344_v14, %v299_v7  ;;  %v400_v23 = vrot.slane %v357_v15, 4 }
  0xcc   :  { %v385_v24 = vadd.f32 %v384_v16, %v383_v8  ;;  %v336_v29 = vrot.slane %v335_v21, 1  ;;  %v391_v33 = vadd.f32 %v390_v25, %v389_v17  ;;  %v331_v36 = vadd.f32 %v330_v20, %v329_v12 }
  0xcd   :  { %v340_v26 = vrot.slane %v339_v18, 2  ;;  %v395_v27 = vadd.f32 %v394_v19, %v356_v11  ;;  %v346_v30 = vrot.slane %v345_v22, 2  ;;  %v401_v31 = vadd.f32 %v400_v23, %v357_v15 }
  0xce   :  { %v386_v32 = vrot.slane %v385_v24, 1  ;;  %v337_v37 = vadd.f32 %v336_v29, %v335_v21  ;;  %v392_v41 = vrot.slane %v391_v33, 1  ;;  %v417_v55 = vrot.slane %v331_v36, 4 }
  0xcf   :  { %v341_v34 = vadd.f32 %v340_v26, %v339_v18  ;;  %v396_v35 = vrot.slane %v395_v27, 2  ;;  %v347_v38 = vadd.f32 %v346_v30, %v345_v22  ;;  %v402_v39 = vrot.slane %v401_v31, 2 }
  0xd0   :  { %v387_v45 = vadd.f32 %v386_v32, %v385_v24  ;;  %v393_v50 = vadd.f32 %v392_v41, %v391_v33  ;;  %v418_v57 = vrot.slane %v337_v37, 3  ;;  %v452_v6 = vsel %vm421_vm1, %v363_v48, %v445_v44 }
  0xd1   :  { %v342_v42 = vrot.slane %v341_v34, 1  ;;  %v397_v43 = vadd.f32 %v396_v35, %v395_v27  ;;  %v348_v46 = vrot.slane %v347_v38, 1  ;;  %v403_v47 = vadd.f32 %v402_v39, %v401_v31 }
  0xd2   :  { %v448_v58 = vrot.slane %v387_v45, 4  ;;  %v449_v1 = vrot.slane %v393_v50, 3  ;;  %v428_v7 = vsel %vm427_vm2, %v417_v55, %v418_v57  ;;  %v426_v63 = vsel %vm425_vm4, %v422_v56, %v424_v28 }
  0xd3   :  { %v343_v51 = vadd.f32 %v342_v42, %v341_v34  ;;  %v398_v54 = vrot.slane %v397_v43, 1  ;;  %v349_v59 = vadd.f32 %v348_v46, %v347_v38  ;;  %v404_v60 = vrot.slane %v403_v47, 1 }
  0xd4   :  { %v455_v9 = vsel %vm427_vm2, %v448_v58, %v449_v1  ;;  %v454_v2 = vsel %vm425_vm4, %v452_v6, %v453_v53 }
  0xd5   :  { %v399_v61 = vadd.f32 %v398_v54, %v397_v43  ;;  %v419_v0 = vrot.slane %v343_v51, 2  ;;  %v405_v4 = vadd.f32 %v404_v60, %v403_v47  ;;  %v420_v5 = vrot.slane %v349_v59, 1 }
  0xd7   :  { %v450_v3 = vrot.slane %v399_v61, 2  ;;  %v430_v49 = vsel %vm429_vm3, %v419_v0, %v420_v5  ;;  %v451_v62 = vrot.slane %v405_v4, 1 }
  0xd8   :  { %v432_v8 = vsel %vm431_vm5, %v428_v7, %v430_v49 }
  0xd9   :  { %v434_v10 = vsel %vm433_vm6, %v426_v63, %v432_v8  ;;  %v456_v52 = vsel %vm429_vm3, %v450_v3, %v451_v62 }
  0xda   :  { %436 = vst [vmem:[%s926_s2] sm:$0xff] %v434_v10  ;;  %v457_v11 = vsel %vm431_vm5, %v455_v9, %v456_v52 }
  0xdb   :  { %v458_v12 = vsel %vm433_vm6, %v454_v2, %v457_v11 }
  0xdc   :  { %460 = vst [vmem:[%s927_s3] sm:$0xff] %v458_v12 }

// kernel: conv2d_forward.3
= control target key start
LH: loop header
LB: loop body
LE: loop exit
PB: predicated region body
PF: predicated region fallthrough
CT: control target
= control target key end

     0   :  { %s820_s1 = inlined_call_operand.vmem [shape: f32[128,1024], index: 1, kind: input, shape index: {}]   ;;  %s821_s0 = inlined_call_operand.vmem [shape: f32[8,128], index: 0, kind: input, shape index: {}]   ;;  %s822_s2 = inlined_call_operand.vmem [shape: f32[1,1024], index: 2, kind: input, shape index: {}]   ;;  %s823_s3 = inlined_call_operand.vmem [shape: f32[1,1024], index: 3, kind: input, shape index: {}]   ;;  %s824_s4 = inlined_call_operand.vmem [shape: f32[8,1024], index: 4, kind: output, shape index: {}]  }
   0x1   :  { %v140_v0 = vld [vmem:[%s820_s1 + $0x3d0] sm:$0xff]  ;;  %v141_v1 = vld [vmem:[%s820_s1 + $0x3d8] sm:$0xff]  ;;  %v138_v6 = vld [vmem:[%s820_s1 + $0x3c0] sm:$0xff] }
   0x2   :  { %v132_v2 = vld [vmem:[%s820_s1 + $0x390] sm:$0xff]  ;;  %186 = vmatpush.msra.mxu2 %v140_v0  ;;  %206 = vmatpush.msra.mxu3 %v141_v1  ;;  %v133_v3 = vld [vmem:[%s820_s1 + $0x398] sm:$0xff]  ;;  %v139_v7 = vld [vmem:[%s820_s1 + $0x3c8] sm:$0xff] }
   0x3   :  { %v124_v4 = vld [vmem:[%s820_s1 + $0x350] sm:$0xff]  ;;  %v125_v5 = vld [vmem:[%s820_s1 + $0x358] sm:$0xff]  ;;  %v130_v8 = vld [vmem:[%s820_s1 + $0x380] sm:$0xff]  ;;  %146 = vmatpush.msra.mxu0 %v138_v6  ;;  %166 = vmatpush.msra.mxu1 %v139_v7 }
   0x4   :  { %187 = vmatpush.msra.mxu2 %v132_v2  ;;  %207 = vmatpush.msra.mxu3 %v133_v3  ;;  %v131_v9 = vld [vmem:[%s820_s1 + $0x388] sm:$0xff]  ;;  %v116_v10 = vld [vmem:[%s820_s1 + $0x310] sm:$0xff]  ;;  %v117_v11 = vld [vmem:[%s820_s1 + $0x318] sm:$0xff] }
   0x5   :  { %v122_v12 = vld [vmem:[%s820_s1 + $0x340] sm:$0xff]  ;;  %v123_v13 = vld [vmem:[%s820_s1 + $0x348] sm:$0xff]  ;;  %147 = vmatpush.msra.mxu0 %v130_v8  ;;  %167 = vmatpush.msra.mxu1 %v131_v9  ;;  %v108_v14 = vld [vmem:[%s820_s1 + $0x2d0] sm:$0xff] }
   0x6   :  { %188 = vmatpush.msra.mxu2 %v124_v4  ;;  %208 = vmatpush.msra.mxu3 %v125_v5  ;;  %v109_v15 = vld [vmem:[%s820_s1 + $0x2d8] sm:$0xff]  ;;  %v114_v16 = vld [vmem:[%s820_s1 + $0x300] sm:$0xff]  ;;  %v115_v17 = vld [vmem:[%s820_s1 + $0x308] sm:$0xff] }
   0x7   :  { %148 = vmatpush.msra.mxu0 %v122_v12  ;;  %168 = vmatpush.msra.mxu1 %v123_v13  ;;  %v100_v18 = vld [vmem:[%s820_s1 + $0x290] sm:$0xff]  ;;  %v101_v19 = vld [vmem:[%s820_s1 + $0x298] sm:$0xff]  ;;  %v106_v20 = vld [vmem:[%s820_s1 + $0x2c0] sm:$0xff] }
   0x8   :  { %189 = vmatpush.msra.mxu2 %v116_v10  ;;  %209 = vmatpush.msra.mxu3 %v117_v11  ;;  %v107_v21 = vld [vmem:[%s820_s1 + $0x2c8] sm:$0xff]  ;;  %v92_v22 = vld [vmem:[%s820_s1 + $0x250] sm:$0xff]  ;;  %v93_v23 = vld [vmem:[%s820_s1 + $0x258] sm:$0xff] }
   0x9   :  { %149 = vmatpush.msra.mxu0 %v114_v16  ;;  %169 = vmatpush.msra.mxu1 %v115_v17  ;;  %v98_v24 = vld [vmem:[%s820_s1 + $0x280] sm:$0xff]  ;;  %v99_v25 = vld [vmem:[%s820_s1 + $0x288] sm:$0xff]  ;;  %v84_v26 = vld [vmem:[%s820_s1 + $0x210] sm:$0xff] }
   0xa   :  { %190 = vmatpush.msra.mxu2 %v108_v14  ;;  %210 = vmatpush.msra.mxu3 %v109_v15  ;;  %v85_v27 = vld [vmem:[%s820_s1 + $0x218] sm:$0xff]  ;;  %v90_v28 = vld [vmem:[%s820_s1 + $0x240] sm:$0xff]  ;;  %v91_v29 = vld [vmem:[%s820_s1 + $0x248] sm:$0xff] }
   0xb   :  { %150 = vmatpush.msra.mxu0 %v106_v20  ;;  %170 = vmatpush.msra.mxu1 %v107_v21  ;;  %v76_v30 = vld [vmem:[%s820_s1 + $0x1d0] sm:$0xff]  ;;  %v77_v31 = vld [vmem:[%s820_s1 + $0x1d8] sm:$0xff]  ;;  %v82_v32 = vld [vmem:[%s820_s1 + $0x200] sm:$0xff] }
   0xc   :  { %191 = vmatpush.msra.mxu2 %v100_v18  ;;  %211 = vmatpush.msra.mxu3 %v101_v19  ;;  %v83_v33 = vld [vmem:[%s820_s1 + $0x208] sm:$0xff]  ;;  %v68_v34 = vld [vmem:[%s820_s1 + $0x190] sm:$0xff]  ;;  %v69_v35 = vld [vmem:[%s820_s1 + $0x198] sm:$0xff] }
   0xd   :  { %151 = vmatpush.msra.mxu0 %v98_v24  ;;  %171 = vmatpush.msra.mxu1 %v99_v25  ;;  %v74_v36 = vld [vmem:[%s820_s1 + $0x1c0] sm:$0xff]  ;;  %v75_v37 = vld [vmem:[%s820_s1 + $0x1c8] sm:$0xff]  ;;  %v60_v38 = vld [vmem:[%s820_s1 + $0x150] sm:$0xff] }
   0xe   :  { %192 = vmatpush.msra.mxu2 %v92_v22  ;;  %212 = vmatpush.msra.mxu3 %v93_v23  ;;  %v61_v39 = vld [vmem:[%s820_s1 + $0x158] sm:$0xff]  ;;  %v66_v40 = vld [vmem:[%s820_s1 + $0x180] sm:$0xff]  ;;  %v67_v41 = vld [vmem:[%s820_s1 + $0x188] sm:$0xff] }
   0xf   :  { %152 = vmatpush.msra.mxu0 %v90_v28  ;;  %172 = vmatpush.msra.mxu1 %v91_v29  ;;  %v52_v42 = vld [vmem:[%s820_s1 + $0x110] sm:$0xff]  ;;  %v53_v43 = vld [vmem:[%s820_s1 + $0x118] sm:$0xff]  ;;  %v58_v44 = vld [vmem:[%s820_s1 + $0x140] sm:$0xff] }
  0x10   :  { %193 = vmatpush.msra.mxu2 %v84_v26  ;;  %213 = vmatpush.msra.mxu3 %v85_v27  ;;  %v59_v45 = vld [vmem:[%s820_s1 + $0x148] sm:$0xff]  ;;  %v44_v46 = vld [vmem:[%s820_s1 + $0xd0] sm:$0xff]  ;;  %v45_v47 = vld [vmem:[%s820_s1 + $0xd8] sm:$0xff] }
  0x11   :  { %153 = vmatpush.msra.mxu0 %v82_v32  ;;  %173 = vmatpush.msra.mxu1 %v83_v33  ;;  %v50_v48 = vld [vmem:[%s820_s1 + $0x100] sm:$0xff]  ;;  %v51_v49 = vld [vmem:[%s820_s1 + $0x108] sm:$0xff]  ;;  %v36_v50 = vld [vmem:[%s820_s1 + $0x90] sm:$0xff] }
  0x12   :  { %194 = vmatpush.msra.mxu2 %v76_v30  ;;  %214 = vmatpush.msra.mxu3 %v77_v31  ;;  %v37_v51 = vld [vmem:[%s820_s1 + $0x98] sm:$0xff]  ;;  %v42_v52 = vld [vmem:[%s820_s1 + $0xc0] sm:$0xff]  ;;  %v43_v53 = vld [vmem:[%s820_s1 + $0xc8] sm:$0xff] }
  0x13   :  { %154 = vmatpush.msra.mxu0 %v74_v36  ;;  %174 = vmatpush.msra.mxu1 %v75_v37  ;;  %v28_v54 = vld [vmem:[%s820_s1 + $0x50] sm:$0xff]  ;;  %v29_v55 = vld [vmem:[%s820_s1 + $0x58] sm:$0xff]  ;;  %v34_v56 = vld [vmem:[%s820_s1 + $0x80] sm:$0xff] }
  0x14   :  { %195 = vmatpush.msra.mxu2 %v68_v34  ;;  %215 = vmatpush.msra.mxu3 %v69_v35  ;;  %v35_v57 = vld [vmem:[%s820_s1 + $0x88] sm:$0xff]  ;;  %v20_v58 = vld [vmem:[%s820_s1 + $0x10] sm:$0xff]  ;;  %v21_v59 = vld [vmem:[%s820_s1 + $0x18] sm:$0xff] }
  0x15   :  { %155 = vmatpush.msra.mxu0 %v66_v40  ;;  %175 = vmatpush.msra.mxu1 %v67_v41  ;;  %v144_v60 = vld [vmem:[%s820_s1 + $0x3f0] sm:$0xff]  ;;  %v145_v61 = vld [vmem:[%s820_s1 + $0x3f8] sm:$0xff]  ;;  %v26_v62 = vld [vmem:[%s820_s1 + $0x40] sm:$0xff] }
  0x16   :  { %196 = vmatpush.msra.mxu2 %v60_v38  ;;  %216 = vmatpush.msra.mxu3 %v61_v39  ;;  %v27_v63 = vld [vmem:[%s820_s1 + $0x48] sm:$0xff]  ;;  %v136_v0 = vld [vmem:[%s820_s1 + $0x3b0] sm:$0xff]  ;;  %v137_v1 = vld [vmem:[%s820_s1 + $0x3b8] sm:$0xff] }
  0x17   :  { %156 = vmatpush.msra.mxu0 %v58_v44  ;;  %176 = vmatpush.msra.mxu1 %v59_v45  ;;  %v18_v2 = vld [vmem:[%s820_s1] sm:$0xff]  ;;  %v19_v3 = vld [vmem:[%s820_s1 + $0x8] sm:$0xff]  ;;  %v128_v4 = vld [vmem:[%s820_s1 + $0x370] sm:$0xff] }
  0x18   :  { %197 = vmatpush.msra.mxu2 %v52_v42  ;;  %217 = vmatpush.msra.mxu3 %v53_v43  ;;  %v129_v5 = vld [vmem:[%s820_s1 + $0x378] sm:$0xff]  ;;  %v142_v6 = vld [vmem:[%s820_s1 + $0x3e0] sm:$0xff]  ;;  %v143_v7 = vld [vmem:[%s820_s1 + $0x3e8] sm:$0xff] }
  0x19   :  { %157 = vmatpush.msra.mxu0 %v50_v48  ;;  %177 = vmatpush.msra.mxu1 %v51_v49  ;;  %v120_v8 = vld [vmem:[%s820_s1 + $0x330] sm:$0xff]  ;;  %v121_v9 = vld [vmem:[%s820_s1 + $0x338] sm:$0xff]  ;;  %v134_v10 = vld [vmem:[%s820_s1 + $0x3a0] sm:$0xff] }
  0x1a   :  { %198 = vmatpush.msra.mxu2 %v44_v46  ;;  %218 = vmatpush.msra.mxu3 %v45_v47  ;;  %v135_v11 = vld [vmem:[%s820_s1 + $0x3a8] sm:$0xff]  ;;  %v112_v12 = vld [vmem:[%s820_s1 + $0x2f0] sm:$0xff]  ;;  %v113_v13 = vld [vmem:[%s820_s1 + $0x2f8] sm:$0xff] }
  0x1b   :  { %158 = vmatpush.msra.mxu0 %v42_v52  ;;  %178 = vmatpush.msra.mxu1 %v43_v53  ;;  %v126_v14 = vld [vmem:[%s820_s1 + $0x360] sm:$0xff]  ;;  %v127_v15 = vld [vmem:[%s820_s1 + $0x368] sm:$0xff]  ;;  %v104_v16 = vld [vmem:[%s820_s1 + $0x2b0] sm:$0xff] }
  0x1c   :  { %199 = vmatpush.msra.mxu2 %v36_v50  ;;  %219 = vmatpush.msra.mxu3 %v37_v51  ;;  %v105_v17 = vld [vmem:[%s820_s1 + $0x2b8] sm:$0xff]  ;;  %v118_v18 = vld [vmem:[%s820_s1 + $0x320] sm:$0xff]  ;;  %v119_v19 = vld [vmem:[%s820_s1 + $0x328] sm:$0xff] }
  0x1d   :  { %159 = vmatpush.msra.mxu0 %v34_v56  ;;  %179 = vmatpush.msra.mxu1 %v35_v57  ;;  %v96_v20 = vld [vmem:[%s820_s1 + $0x270] sm:$0xff]  ;;  %v97_v21 = vld [vmem:[%s820_s1 + $0x278] sm:$0xff]  ;;  %v110_v22 = vld [vmem:[%s820_s1 + $0x2e0] sm:$0xff] }
  0x1e   :  { %200 = vmatpush.msra.mxu2 %v28_v54  ;;  %220 = vmatpush.msra.mxu3 %v29_v55  ;;  %v111_v23 = vld [vmem:[%s820_s1 + $0x2e8] sm:$0xff]  ;;  %v88_v24 = vld [vmem:[%s820_s1 + $0x230] sm:$0xff]  ;;  %v89_v25 = vld [vmem:[%s820_s1 + $0x238] sm:$0xff] }
  0x1f   :  { %160 = vmatpush.msra.mxu0 %v26_v62  ;;  %180 = vmatpush.msra.mxu1 %v27_v63  ;;  %v102_v26 = vld [vmem:[%s820_s1 + $0x2a0] sm:$0xff]  ;;  %v103_v27 = vld [vmem:[%s820_s1 + $0x2a8] sm:$0xff]  ;;  %v80_v28 = vld [vmem:[%s820_s1 + $0x1f0] sm:$0xff] }
  0x20   :  { %201 = vmatpush.msra.mxu2 %v20_v58  ;;  %221 = vmatpush.msra.mxu3 %v21_v59  ;;  %v81_v29 = vld [vmem:[%s820_s1 + $0x1f8] sm:$0xff]  ;;  %v94_v30 = vld [vmem:[%s820_s1 + $0x260] sm:$0xff]  ;;  %v95_v31 = vld [vmem:[%s820_s1 + $0x268] sm:$0xff] }
  0x21   :  { %161 = vmatpush.msra.mxu0 %v18_v2  ;;  %181 = vmatpush.msra.mxu1 %v19_v3  ;;  %v72_v32 = vld [vmem:[%s820_s1 + $0x1b0] sm:$0xff]  ;;  %v73_v33 = vld [vmem:[%s820_s1 + $0x1b8] sm:$0xff]  ;;  %v86_v34 = vld [vmem:[%s820_s1 + $0x220] sm:$0xff] }
  0x22   :  { %266 = vmatpush.msrb.mxu2 %v144_v60  ;;  %286 = vmatpush.msrb.mxu3 %v145_v61  ;;  %v87_v35 = vld [vmem:[%s820_s1 + $0x228] sm:$0xff]  ;;  %v64_v36 = vld [vmem:[%s820_s1 + $0x170] sm:$0xff]  ;;  %v65_v37 = vld [vmem:[%s820_s1 + $0x178] sm:$0xff] }
  0x23   :  { %226 = vmatpush.msrb.mxu0 %v142_v6  ;;  %246 = vmatpush.msrb.mxu1 %v143_v7  ;;  %v78_v38 = vld [vmem:[%s820_s1 + $0x1e0] sm:$0xff]  ;;  %v79_v39 = vld [vmem:[%s820_s1 + $0x1e8] sm:$0xff]  ;;  %v56_v40 = vld [vmem:[%s820_s1 + $0x130] sm:$0xff] }
  0x24   :  { %267 = vmatpush.msrb.mxu2 %v136_v0  ;;  %287 = vmatpush.msrb.mxu3 %v137_v1  ;;  %v57_v41 = vld [vmem:[%s820_s1 + $0x138] sm:$0xff]  ;;  %v17_v42 = vld [vmem:[%s821_s0] sm:$0xff]  ;;  %v71_v44 = vld [vmem:[%s820_s1 + $0x1a8] sm:$0xff] }
  0x25   :  { %227 = vmatpush.msrb.mxu0 %v134_v10  ;;  %247 = vmatpush.msrb.mxu1 %v135_v11  ;;  %v70_v43 = vld [vmem:[%s820_s1 + $0x1a0] sm:$0xff]  ;;  %v48_v45 = vld [vmem:[%s820_s1 + $0xf0] sm:$0xff]  ;;  %v49_v46 = vld [vmem:[%s820_s1 + $0xf8] sm:$0xff] }
  0x26   :  { %268 = vmatpush.msrb.mxu2 %v128_v4  ;;  %288 = vmatpush.msrb.mxu3 %v129_v5  ;;  %v62_v47 = vld [vmem:[%s820_s1 + $0x160] sm:$0xff]  ;;  %v63_v48 = vld [vmem:[%s820_s1 + $0x168] sm:$0xff]  ;;  %v40_v49 = vld [vmem:[%s820_s1 + $0xb0] sm:$0xff] }
  0x27   :  { %228 = vmatpush.msrb.mxu0 %v126_v14  ;;  %248 = vmatpush.msrb.mxu1 %v127_v15  ;;  %v41_v50 = vld [vmem:[%s820_s1 + $0xb8] sm:$0xff]  ;;  %v54_v51 = vld [vmem:[%s820_s1 + $0x120] sm:$0xff]  ;;  %v55_v52 = vld [vmem:[%s820_s1 + $0x128] sm:$0xff] }
  0x28   :  { %269 = vmatpush.msrb.mxu2 %v120_v8  ;;  %289 = vmatpush.msrb.mxu3 %v121_v9  ;;  %v32_v53 = vld [vmem:[%s820_s1 + $0x70] sm:$0xff]  ;;  %v33_v54 = vld [vmem:[%s820_s1 + $0x78] sm:$0xff]  ;;  %v46_v55 = vld [vmem:[%s820_s1 + $0xe0] sm:$0xff] }
  0x29   :  { %229 = vmatpush.msrb.mxu0 %v118_v18  ;;  %249 = vmatpush.msrb.mxu1 %v119_v19  ;;  %v47_v56 = vld [vmem:[%s820_s1 + $0xe8] sm:$0xff]  ;;  %v24_v57 = vld [vmem:[%s820_s1 + $0x30] sm:$0xff]  ;;  %v25_v58 = vld [vmem:[%s820_s1 + $0x38] sm:$0xff] }
  0x2a   :  { %270 = vmatpush.msrb.mxu2 %v112_v12  ;;  %290 = vmatpush.msrb.mxu3 %v113_v13  ;;  %v38_v59 = vld [vmem:[%s820_s1 + $0xa0] sm:$0xff]  ;;  %v39_v60 = vld [vmem:[%s820_s1 + $0xa8] sm:$0xff] }
  0x2b   :  { %230 = vmatpush.msrb.mxu0 %v110_v22  ;;  %250 = vmatpush.msrb.mxu1 %v111_v23  ;;  %v30_v61 = vld [vmem:[%s820_s1 + $0x60] sm:$0xff]  ;;  %v31_v62 = vld [vmem:[%s820_s1 + $0x68] sm:$0xff] }
  0x2c   :  { %271 = vmatpush.msrb.mxu2 %v104_v16  ;;  %291 = vmatpush.msrb.mxu3 %v105_v17  ;;  %v22_v63 = vld [vmem:[%s820_s1 + $0x20] sm:$0xff]  ;;  %v23_v0 = vld [vmem:[%s820_s1 + $0x28] sm:$0xff] }
  0x2d   :  { %231 = vmatpush.msrb.mxu0 %v102_v26  ;;  %251 = vmatpush.msrb.mxu1 %v103_v27  ;;  %v306_v1 = vld [vmem:[%s822_s2] sm:$0xff] }
  0x2e   :  { %272 = vmatpush.msrb.mxu2 %v96_v20  ;;  %292 = vmatpush.msrb.mxu3 %v97_v21  ;;  %v332_v2 = vld [vmem:[%s823_s3] sm:$0xff]  ;;  %v310_v3 = vperm.slane %v306_v1, 2  ;;  %v311_v4 = vperm.slane %v306_v1, 3  ;;  %v308_v5 = vperm.slane %v306_v1, 0  ;;  %v309_v6 = vperm.slane %v306_v1, 1 }
  0x2f   :  { %232 = vmatpush.msrb.mxu0 %v94_v30  ;;  %252 = vmatpush.msrb.mxu1 %v95_v31  ;;  %v336_v7 = vperm.slane %v332_v2, 2  ;;  %v337_v8 = vperm.slane %v332_v2, 3  ;;  %v334_v9 = vperm.slane %v332_v2, 0  ;;  %v335_v10 = vperm.slane %v332_v2, 1 }
  0x30   :  { %273 = vmatpush.msrb.mxu2 %v88_v24  ;;  %293 = vmatpush.msrb.mxu3 %v89_v25  ;;  %v312_v27 = vperm.slane %v306_v1, 4  ;;  %v315_v30 = vperm.slane %v306_v1, 7  ;;  %v338_v31 = vperm.slane %v332_v2, 4 }
  0x31   :  { %233 = vmatpush.msrb.mxu0 %v86_v34  ;;  %253 = vmatpush.msrb.mxu1 %v87_v35  ;;  %v340_v35 = vperm.slane %v332_v2, 6 }
  0x32   :  { %274 = vmatpush.msrb.mxu2 %v80_v28  ;;  %294 = vmatpush.msrb.mxu3 %v81_v29  ;;  %v313_v28 = vperm.slane %v306_v1, 5  ;;  %v314_v29 = vperm.slane %v306_v1, 6 }
  0x33   :  { %234 = vmatpush.msrb.mxu0 %v78_v38  ;;  %254 = vmatpush.msrb.mxu1 %v79_v39 }
  0x34   :  { %275 = vmatpush.msrb.mxu2 %v72_v32  ;;  %295 = vmatpush.msrb.mxu3 %v73_v33  ;;  %v339_v32 = vperm.slane %v332_v2, 5 }
  0x35   :  { %202 = vmatmul.f32.vlgmr.msra.gmra.mxu2 %v17_v42  ;;  %222 = vmatmul.f32.vlgmr.msra.gmra.mxu3 %v17_v42 }
  0x36   :  { %276 = vmatpush.msrb.mxu2 %v64_v36  ;;  %296 = vmatpush.msrb.mxu3 %v65_v37  ;;  %v341_v36 = vperm.slane %v332_v2, 7 }
  0x37   :  { %235 = vmatpush.msrb.mxu0 %v70_v43  ;;  %255 = vmatpush.msrb.mxu1 %v71_v44 }
  0x38   :  { %277 = vmatpush.msrb.mxu2 %v56_v40  ;;  %297 = vmatpush.msrb.mxu3 %v57_v41 }
  0x39   :  { %236 = vmatpush.msrb.mxu0 %v62_v47  ;;  %256 = vmatpush.msrb.mxu1 %v63_v48 }
  0x3a   :  { %278 = vmatpush.msrb.mxu2 %v48_v45  ;;  %298 = vmatpush.msrb.mxu3 %v49_v46 }
  0x3b   :  { %237 = vmatpush.msrb.mxu0 %v54_v51  ;;  %257 = vmatpush.msrb.mxu1 %v55_v52 }
  0x3c   :  { %279 = vmatpush.msrb.mxu2 %v40_v49  ;;  %299 = vmatpush.msrb.mxu3 %v41_v50 }
  0x3d   :  { %162 = vmatmul.f32.vlgmr.msra.gmra.mxu0 %v17_v42  ;;  %182 = vmatmul.f32.vlgmr.msra.gmra.mxu1 %v17_v42 }
  0x3e   :  { %280 = vmatpush.msrb.mxu2 %v32_v53  ;;  %300 = vmatpush.msrb.mxu3 %v33_v54 }
  0x3f   :  { %238 = vmatpush.msrb.mxu0 %v46_v55  ;;  %258 = vmatpush.msrb.mxu1 %v47_v56 }
  0x40   :  { %281 = vmatpush.msrb.mxu2 %v24_v57  ;;  %301 = vmatpush.msrb.mxu3 %v25_v58 }
  0x41   :  { %282 = vmatmul.f32.vlgmr.msrb.gmra.mxu2 %v17_v42  ;;  %302 = vmatmul.f32.vlgmr.msrb.gmra.mxu3 %v17_v42 }
  0x42   :  { %239 = vmatpush.msrb.mxu0 %v38_v59  ;;  %259 = vmatpush.msrb.mxu1 %v39_v60 }
  0x44   :  { %240 = vmatpush.msrb.mxu0 %v30_v61  ;;  %260 = vmatpush.msrb.mxu1 %v31_v62 }
  0x46   :  { %241 = vmatpush.msrb.mxu0 %v22_v63  ;;  %261 = vmatpush.msrb.mxu1 %v23_v0 }
  0x47   :  { %242 = vmatmul.f32.vlgmr.msrb.gmra.mxu0 %v17_v42  ;;  %262 = vmatmul.f32.vlgmr.msrb.gmra.mxu1 %v17_v42 }
  0xb8   :  { %v203_v11 = vpop.f32.mrf.mxu2  ;;  %v223_v12 = vpop.f32.mrf.mxu3 }
  0xb9   :  { %v326_v15 = vmul.f32 %v310_v3, %v203_v11  ;;  %v327_v16 = vmul.f32 %v311_v4, %v223_v12 }
  0xba   :  { %v163_v13 = vpop.f32.mrf.mxu0  ;;  %v183_v14 = vpop.f32.mrf.mxu1 }
  0xbb   :  { %v324_v17 = vmul.f32 %v308_v5, %v163_v13  ;;  %v325_v18 = vmul.f32 %v309_v6, %v183_v14  ;;  %v352_v19 = vadd.f32 %v336_v7, %v326_v15  ;;  %v353_v20 = vadd.f32 %v337_v8, %v327_v16 }
  0xbd   :  { %v350_v21 = vadd.f32 %v334_v9, %v324_v17  ;;  %v351_v22 = vadd.f32 %v335_v10, %v325_v18  ;;  %v360_v23 = vmax.f32 %v352_v19, 0.0  ;;  %v361_v26 = vmax.f32 %v353_v20, 0.0 }
  0xbf   :  { %v358_v24 = vmax.f32 %v350_v21, 0.0  ;;  %v359_v25 = vmax.f32 %v351_v22, 0.0  ;;  %368 = vst [vmem:[%s824_s4 + $0x10] sm:$0xff] %v360_v23 }
  0xc0   :  { %369 = vst [vmem:[%s824_s4 + $0x18] sm:$0xff] %v361_v26 }
  0xc1   :  { %366 = vst [vmem:[%s824_s4] sm:$0xff] %v358_v24 }
  0xc2   :  { %367 = vst [vmem:[%s824_s4 + $0x8] sm:$0xff] %v359_v25 }
  0xc4   :  { %v243_v33 = vpop.f32.mrf.mxu0  ;;  %v263_v34 = vpop.f32.mrf.mxu1 }
  0xc5   :  { %v328_v37 = vmul.f32 %v312_v27, %v243_v33  ;;  %v329_v38 = vmul.f32 %v313_v28, %v263_v34  ;;  %v283_v39 = vpop.f32.mrf.mxu2  ;;  %v303_v40 = vpop.f32.mrf.mxu3 }
  0xc6   :  { %v330_v41 = vmul.f32 %v314_v29, %v283_v39  ;;  %v331_v42 = vmul.f32 %v315_v30, %v303_v40 }
  0xc7   :  { %v354_v43 = vadd.f32 %v338_v31, %v328_v37  ;;  %v355_v44 = vadd.f32 %v339_v32, %v329_v38 }
  0xc8   :  { %v356_v45 = vadd.f32 %v340_v35, %v330_v41  ;;  %v357_v46 = vadd.f32 %v341_v36, %v331_v42 }
  0xc9   :  { %v362_v47 = vmax.f32 %v354_v43, 0.0  ;;  %v363_v48 = vmax.f32 %v355_v44, 0.0 }
  0xca   :  { %v364_v49 = vmax.f32 %v356_v45, 0.0  ;;  %v365_v50 = vmax.f32 %v357_v46, 0.0 }
  0xcb   :  { %370 = vst [vmem:[%s824_s4 + $0x20] sm:$0xff] %v362_v47 }
  0xcc   :  { %371 = vst [vmem:[%s824_s4 + $0x28] sm:$0xff] %v363_v48 }
  0xcd   :  { %372 = vst [vmem:[%s824_s4 + $0x30] sm:$0xff] %v364_v49 }
  0xce   :  { %373 = vst [vmem:[%s824_s4 + $0x38] sm:$0xff] %v365_v50 }

</bundles_post_ra>
